<compile_context>
chip_gen: v5e
topology: v5e:2x2
jax: 0.10.0
libtpu: 0.0.40
codegen_flags: <defaults>
</compile_context>

<pallas_src>
import jax
import jax.numpy as jnp
import numpy as np
from jax.experimental import pallas as pl
from jax.experimental.pallas import tpu as pltpu


def _ape_kernel(x_ref, prm_ref, seq_ref, o_ref):
    seq40 = seq_ref[...]          # (1, TC)  f32: j/40 for each flat column
    a = prm_ref[:, 0:1]           # (TB, 1)  f32: 1 - end/40
    b = prm_ref[:, 1:2]           # (TB, 1)  f32: 1 + start/40
    end40 = prm_ref[:, 2:3]       # (TB, 1)  f32: end/40
    # j <  end  ->  1 - (end - j)/40  =  a + j/40
    # j >= end  ->  1 - (j - start)/40 = b - j/40
    w = jnp.where(seq40 < end40, a + seq40, b - seq40)   # (TB, TC) f32
    x = x_ref[...]
    if o_ref.dtype == jnp.float32:
        o_ref[...] = w * x
    else:
        # Keep x native; cast only the weight (bf16 VPU path on v6e/v7x).
        o_ref[...] = w.astype(o_ref.dtype) * x


def _round_down(x, m):
    return (x // m) * m


def _choose_tiles(B, SH, itemsize,
                  target_bytes=6 * 1024 * 1024,
                  max_block_bytes=8 * 1024 * 1024):
    """Pick (TB, TC) block dims for the flattened (B, S*H) array."""
    min_rows = B if B <= 8 else 8

    # ---- column (flattened S*H) tile ----
    if SH % 128 != 0:
        # (8,128) rule: a non-128-multiple last dim must be taken whole.
        # TODO(synk): a huge S*H that is not a multiple of 128 cannot be
        # column-tiled here; realistic TNet-LF shapes never hit this.
        tc = SH
    else:
        tc = SH
        if B <= 8 and SH >= 256:
            # Guarantee >=2 grid steps so both v7x TensorCores get work.
            tc = max(128, _round_down(SH // 2, 128))
        # Keep a min_rows-tall block near the byte budget.
        budget_cols = max(128, _round_down(target_bytes // (min_rows * itemsize), 128))
        tc = min(tc, budget_cols)

    n_col = -(-SH // tc)

    # ---- batch tile ----
    if B <= 8:
        tb = B
    else:
        rows = max(8, target_bytes // max(tc * itemsize, 1))
        tb = max(8, _round_down(min(rows, B), 8))
        while tb > 8 and tb * tc * itemsize > max_block_bytes:
            tb -= 8
        if n_col <= 1:
            # Ensure >=2 batch steps (v7x dual-TC) when columns are not split.
            tb = min(tb, max(8, _round_down(B - 1, 8)))
    return tb, tc


def absolute_position_embedding(x, pos_inx):
    B, S, H = x.shape
    SH = S * H
    itemsize = jnp.dtype(x.dtype).itemsize

    x_flat = x.reshape(B, SH)                  # free: collapses contiguous dims

    # Per-row constants (B, 3): [a, b, end40] = [1-end/40, 1+start/40, end/40]
    pos_f = pos_inx.astype(jnp.float32)
    start40 = pos_f[:, 0:1] / 40.0
    end40 = pos_f[:, 1:2] / 40.0
    params = jnp.concatenate([1.0 - end40, 1.0 + start40, end40], axis=1)

    # seq40[j_flat] = (sequence index of flat column)/40, shape (1, S*H) f32.
    seq40 = jnp.broadcast_to(
        (jnp.arange(S, dtype=jnp.float32) / 40.0)[:, None], (S, H)).reshape(1, SH)

    TB, TC = _choose_tiles(B, SH, itemsize)
    grid = (pl.cdiv(B, TB), pl.cdiv(SH, TC))

    # Scoped VMEM: double-buffered x in + out blocks + small side inputs.
    x_block = TB * TC * itemsize
    side_block = TC * 4 + TB * 128 * 4
    vmem_needed = 2 * (2 * x_block + side_block) + (2 << 20)
    vmem_limit = int(min(max(vmem_needed, 32 << 20), 48 << 20))

    cost = pl.CostEstimate(
        flops=4 * B * SH,
        transcendentals=0,
        bytes_accessed=2 * B * SH * itemsize + SH * 4 + 3 * B * 4,
    )

    out_flat = pl.pallas_call(
        _ape_kernel,
        out_shape=jax.ShapeDtypeStruct((B, SH), x.dtype),
        grid=grid,
        in_specs=[
            pl.BlockSpec((TB, TC), lambda i, j: (i, j)),   # x tile
            pl.BlockSpec((TB, 3), lambda i, j: (i, 0)),    # per-row constants
            pl.BlockSpec((1, TC), lambda i, j: (0, j)),    # seq40 columns
        ],
        out_specs=pl.BlockSpec((TB, TC), lambda i, j: (i, j)),
        compiler_params=pltpu.CompilerParams(
            dimension_semantics=("parallel", "parallel"),
            vmem_limit_bytes=vmem_limit),
        cost_estimate=cost,
    )(x_flat, params, seq40)

    return out_flat.reshape(B, S, H)


def _reference(x, pos_inx):
    # NumPy reference mirroring the PyTorch weight_matrix loops exactly.
    x = np.asarray(x)
    pos = np.asarray(pos_inx)
    B, S, H = x.shape
    w = np.zeros((B, S), dtype=np.float32)
    for i in range(B):
        for j in range(pos[i][1]):
            w[i, j] = 1 - (pos[i][1] - j) / 40
        for j in range(pos[i][1], S):
            w[i, j] = 1 - (j - pos[i][0]) / 40
    return w[:, :, None] * x


if __name__ == "__main__":
    key = jax.random.PRNGKey(0)

    # Case 1: required small case. SH=256 (multiple of 128), B<=8 -> grid (1, 2).
    B, S, H = 2, 8, 32
    kx, key = jax.random.split(key)
    x = jax.random.normal(kx, (B, S, H), dtype=jnp.float32)
    pos_inx = jnp.array([[2, 4], [1, 3]], dtype=jnp.int32)

    out = absolute_position_embedding(x, pos_inx)
    out = jax.block_until_ready(out)
    np.testing.assert_allclose(np.asarray(out), _reference(x, pos_inx),
                               rtol=1e-5, atol=1e-5)

    # Case 2: B>8 with a non-128-multiple SH (full-row column block),
    # batch tiling with a partial last block -> grid (2, 1).
    B2, S2, H2 = 20, 10, 48
    kx2, key = jax.random.split(key)
    x2 = jax.random.normal(kx2, (B2, S2, H2), dtype=jnp.float32)
    starts2 = np.arange(B2, dtype=np.int32) % (S2 - 3)
    ends2 = starts2 + 2
    pos2 = jnp.asarray(np.stack([starts2, ends2], axis=1))

    out2 = absolute_position_embedding(x2, pos2)
    out2 = jax.block_until_ready(out2)
    np.testing.assert_allclose(np.asarray(out2), _reference(x2, pos2),
                               rtol=1e-5, atol=1e-5)

    print("KERNEL_OK")
</pallas_src>

<mosaic_0001>
module attributes {stable_mosaic.version = 11 : i64} {
  func.func @_ape_kernel(%arg0: i32, %arg1: i32, %arg2: memref<2x128xf32, #tpu.memory_space<vmem>>, %arg3: memref<2x3xf32, #tpu.memory_space<vmem>>, %arg4: memref<1x128xf32, #tpu.memory_space<vmem>>, %arg5: memref<2x128xf32, #tpu.memory_space<vmem>>) attributes {dimension_semantics = [#tpu.dimension_semantics<parallel>, #tpu.dimension_semantics<parallel>], iteration_bounds = array<i64: 1, 2>, scalar_prefetch = 0 : i64, scratch_operands = 0 : i64, tpu.core_type = #tpu.core_type<tc>, window_params = [{transform_indices = @transform_0, window_bounds = array<i64: 2, 128>}, {transform_indices = @transform_1, window_bounds = array<i64: 2, 3>}, {transform_indices = @transform_2, window_bounds = array<i64: 1, 128>}, {transform_indices = @transform_3, window_bounds = array<i64: 2, 128>}]} {
    %c0 = arith.constant 0 : index
    %c0_0 = arith.constant 0 : index
    %0 = vector.load %arg4[%c0, %c0_0] : memref<1x128xf32, #tpu.memory_space<vmem>>, vector<1x128xf32>
    %c0_1 = arith.constant 0 : index
    %c0_2 = arith.constant 0 : index
    %1 = vector.load %arg3[%c0_1, %c0_2] : memref<2x3xf32, #tpu.memory_space<vmem>>, vector<2x1xf32>
    %c0_3 = arith.constant 0 : index
    %c1 = arith.constant 1 : index
    %2 = vector.load %arg3[%c0_3, %c1] : memref<2x3xf32, #tpu.memory_space<vmem>>, vector<2x1xf32>
    %c0_4 = arith.constant 0 : index
    %c2 = arith.constant 2 : index
    %3 = vector.load %arg3[%c0_4, %c2] : memref<2x3xf32, #tpu.memory_space<vmem>>, vector<2x1xf32>
    %4 = vector.broadcast %0 : vector<1x128xf32> to vector<2x128xf32>
    %5 = vector.broadcast %3 : vector<2x1xf32> to vector<2x128xf32>
    %6 = arith.cmpf olt, %4, %5 : vector<2x128xf32>
    %7 = vector.broadcast %1 : vector<2x1xf32> to vector<2x128xf32>
    %8 = vector.broadcast %0 : vector<1x128xf32> to vector<2x128xf32>
    %9 = arith.addf %7, %8 : vector<2x128xf32>
    %10 = vector.broadcast %2 : vector<2x1xf32> to vector<2x128xf32>
    %11 = vector.broadcast %0 : vector<1x128xf32> to vector<2x128xf32>
    %12 = arith.subf %10, %11 : vector<2x128xf32>
    %13 = arith.select %6, %9, %12 : vector<2x128xi1>, vector<2x128xf32>
    %c0_5 = arith.constant 0 : index
    %c0_6 = arith.constant 0 : index
    %14 = vector.load %arg2[%c0_5, %c0_6] : memref<2x128xf32, #tpu.memory_space<vmem>>, vector<2x128xf32>
    %15 = arith.mulf %13, %14 : vector<2x128xf32>
    %c0_7 = arith.constant 0 : index
    %c0_8 = arith.constant 0 : index
    %16 = vector.load %arg5[%c0_7, %c0_8] : memref<2x128xf32, #tpu.memory_space<vmem>>, vector<2x128xf32>
    tpu.vector_store %arg5[%c0_7, %c0_8], %15 {strides = array<i32>} : memref<2x128xf32, #tpu.memory_space<vmem>>, vector<2x128xf32>,
    return
  }
  func.func @transform_0(%arg0: i32, %arg1: i32) -> (i32, i32) {
    %c0_i32 = arith.constant 0 : i32
    return %arg0, %arg1 : i32, i32
  }
  func.func @transform_1(%arg0: i32, %arg1: i32) -> (i32, i32) {
    %c0_i32 = arith.constant 0 : i32
    %c0_i32_0 = arith.constant 0 : i32
    return %arg0, %c0_i32 : i32, i32
  }
  func.func @transform_2(%arg0: i32, %arg1: i32) -> (i32, i32) {
    %c0_i32 = arith.constant 0 : i32
    %c0_i32_0 = arith.constant 0 : i32
    return %c0_i32, %arg1 : i32, i32
  }
  func.func @transform_3(%arg0: i32, %arg1: i32) -> (i32, i32) {
    %c0_i32 = arith.constant 0 : i32
    return %arg0, %arg1 : i32, i32
  }
}

</mosaic_0001>

<bundles_post_ra>
// kernel: tpu_custom_call.1
= control target key start
LH: loop header
LB: loop body
LE: loop exit
PB: predicated region body
PF: predicated region fallthrough
CT: control target
= control target key end

     0   :  { %8 = vsyncpa [#allocation3], 0  ;;  %s900_s0 = inlined_call_operand.hbm [shape: f32[2,256], index: 0, kind: input, shape index: {}]   ;;  %s901_s1 = inlined_call_operand.hbm [shape: f32[2,3], index: 1, kind: input, shape index: {}]   ;;  %s902_s2 = inlined_call_operand.hbm [shape: f32[1,256], index: 2, kind: input, shape index: {}]   ;;  %s903_s3 = inlined_call_operand.hbm [shape: f32[2,256], index: 3, kind: output, shape index: {}]  }
   0x1   :  { %10 = vsyncpa [#allocation3 + $0x1], 0 }
   0x2   :  { %11 = vsyncpa [#allocation6], 0 }
   0x3   :  { %12 = vsyncpa [#allocation4], 0 }
   0x4   :  { %14 = vsyncpa [#allocation4 + $0x1], 0  ;;  %s719_s12 = smov 0   ;;  %s721_s13 = smov 0  }
   0x5   :  { %s723_s14 = smov 0   ;;  %s725_s15 = smov 0  }
   0x6   :  { %s727_s16 = smov 0   ;;  %s729_s17 = smov 0  }
   0x7 LB: > { %s29_s18 = sadd.s32 1, %s689_s16  ;;  %s41_s19 = sadd.s32 1, %s681_s14  ;;  %s693_s17 = sphi %s729_s17, %s20_s17   ;;  %s689_s16 = sphi %s727_s16, %s914_s16   ;;  %s685_s15 = sphi %s725_s15, %s913_s15   ;;  %s681_s14 = sphi %s723_s14, %s912_s14   ;;  %s677_s13 = sphi %s721_s13, %s911_s13   ;;  %s673_s12 = sphi %s719_s12, %s910_s12  }
   0x8   : > { %p30_p0 = scmp.ge.s32.totalorder %s29_s18, 2  ;;  %p48_p1 = scmp.ne.s32.totalorder %s681_s14, %s677_s13 }
   0x9   : > { %p49_p2 = scmp.eq.s32.totalorder %s693_s17, 0  ;;  %p417_p3 = scmp.ge.s32.totalorder %s693_s17, 2 }
   0xa   : > { %s916_s18 = smov (%p30_p0, %s29_s18), 0  ;;  %p454_p5 = scmp.lt.s32.totalorder %s693_s17, 2 }
   0xb   : > { %p760_p4 = por %p49_p2, %p48_p1  ;;  %s37_s21 = ssub.s32 %s689_s16, %s916_s18 }
   0xc   : > { %s172_s22 = sand.u32 1, %s693_s17   ;;  %p39_p6 = scmp.eq.s32.totalorder %s37_s21, 0 }
   0xd   : > { %s174_s23 = sand.u32 1, %s681_s14   ;;  %s419_s24 = sshll.u32 %s689_s16, 1 }
   0xe   : > { %s771_s25 = scalar_select %p39_p6, %s681_s14, %s41_s19  }
   0xf   : > { %s418_s26 = sshll.u32 %s174_s23, 1  ;;  %s182_s29 = scalar_lea.hbm %s900_s0, %s419_s24 }
  0x10   : > { %s184_s30 = sshll.u32 %s182_s29, 4  ;;  %s176_s4 = scalar_lea.vmem [#allocation2], %s418_s26  ;;  %s185_s30 = int_to_ptr.hbm [resolvable:$true] %s184_s30 }
  0x11   : > { %s186_s5 = sshll.u32 %s176_s4, 4  ;;  %p782_p7 = pnand %p454_p5, %p760_p4  ;;  %s187_s5 = int_to_ptr.vmem [resolvable:$true] %s186_s5 }
  0x12   : > { %s786_s7 = scalar_lea.sflag [#allocation3], %s172_s22  ;;  %s792_s8 = sadd.s32 4294967295, %s693_s17  }
  0x13   : > { %445 = dma.hbm_to_vmem [thread:$0]  (!%p782_p7), %s185_s30, 32, %s187_s5, %s786_s7  }
  0x14   : > { %s414_s9 = sadd.s32 4294967294, %s693_s17   ;;  %p54_p8 = scmp.ne.s32.totalorder %s677_s13, %s673_s12 }
  0x15   : > { %p55_p9 = scmp.eq.s32.totalorder %s792_s8, 0  ;;  %p132_p10 = scmp.eq.s32.totalorder %s792_s8, 1 }
  0x16   : > { %p138_p11 = scmp.eq.s32.totalorder %s414_s9, 1  ;;  %p415_p12 = scmp.ge.s32.totalorder %s693_s17, 1 }
  0x17   : > { %p802_p13 = por %p55_p9, %p54_p8  ;;  %p809_p0 = por %p132_p10, %p48_p1 }
  0x18   : > { %p813_p2 = por %p138_p11, %p54_p8  ;;  %p145_p4 = scmp.lt.s32.totalorder %s693_s17, 3 }
  0x19   : > { %s159_s22 = sshll.u32 %s901_s1, 4  ;;  %s695_s26 = smov [#allocation5]   ;;  %s160_s22 = int_to_ptr.hbm [resolvable:$true] %s159_s22 }
  0x1a   : > { %p821_p5 = pnand %p415_p12, %p145_p4  ;;  %s161_s27 = sshll.u32 %s695_s26, 4  ;;  %s162_s27 = int_to_ptr.vmem [resolvable:$true] %s161_s27 }
  0x1b   : > { %s199_s30 = scalar_lea.hbm %s902_s2, %s689_s16  ;;  %s196_s5 = scalar_lea.vmem [#allocation7], %s174_s23 }
  0x1c   : > { %p438_p1 = pneg %p821_p5  ;;  %s201_s4 = sshll.u32 %s199_s30, 4  ;;  %s202_s4 = int_to_ptr.hbm [resolvable:$true] %s201_s4 }
  0x1d   : > { %s203_s9 = sshll.u32 %s196_s5, 4  ;;  %212 = sbr.rel (%p821_p5) target bundleno = 175 (0xaf), region = 32  ;;  %s204_s9 = int_to_ptr.vmem [resolvable:$true] %s203_s9 }
  0x1e   : > { %p439_p6 = pnand %p438_p1, %p55_p9  ;;  %s214_s20 = sand.u32 (!%p821_p5), 1, %s792_s8  }
  0x1f   : > { %448 = dma.hbm_to_vmem [thread:$0]  (!%p782_p7), %s202_s4, 16, %s204_s9, %s786_s7  }
  0x20   : > { %441 = dma.hbm_to_vmem [thread:$0]  (!%p439_p6), %s160_s22, 32, %s162_s27, [#allocation6]  }
  0x21   : > { %s842_s21 = sand.u32 (!%p821_p5), 1, %s677_s13   ;;  %s215_s28 = scalar_lea.sflag (!%p821_p5), [#allocation3], %s214_s20 }
  0x22   : > { %s421_s26 = sshll.u32 %s842_s21, 1 }
  0x23   : > { %s218_s23 = scalar_lea.vmem [#allocation2], %s421_s26 }
  0x24   : > { %656 = dma.done.wait (%p802_p13), %s215_s28, 32  }
  0x25   : > { %658 = vsyncadd (%p802_p13), %s215_s28, 4294967264 }
  0x26   : > { %660 = dma.done.wait (%p55_p9), [#allocation6], 32  }
  0x27   : > { %662 = vsyncadd (%p55_p9), [#allocation6], 4294967264  ;;  %s232_s6 = scalar_lea.vmem [#allocation7], %s842_s21 }
  0x28   : > { %664 = dma.done.wait (%p802_p13), %s215_s28, 16  }
  0x29   : > { %666 = vsyncadd (%p802_p13), %s215_s28, 4294967280  ;;  %v696_v0 = vmov 0   ;;  %v697_v1 = vmov 2   ;;  %v261_v2 = vld [vmem:[#allocation5] sm:$0x3]  ;;  %v698_v3 = vmov 1  }
  0x2a   : > { %509 = vset.pattern.permute.xlu0 %v696_v0  ;;  %511 = vset.pattern.permute.xlu1 %v697_v1  ;;  %s425_s7 = sshll.u32 %s685_s15, 1  ;;  %v512_v5 = vld [vmem:[%s232_s6] ss:$0 sm:$0xff]  ;;  %s259_s24 = scalar_lea.vmem [#allocation8], %s421_s26 }
  0x2b   : > { %272 = vperm.xlu0 %509, %v261_v2   ;;  %267 = vperm.xlu1 %511, %v261_v2   ;;  %s298_s22 = scalar_lea.hbm %s903_s3, %s425_s7  ;;  %v282_v10 = vld [vmem:[%s218_s23] sm:$0x3]  ;;  %s300_s27 = sshll.u32 %s259_s24, 4  ;;  %s301_s27 = int_to_ptr.vmem [resolvable:$true] %s300_s27 }
  0x2c   : > { %s302_s29 = sshll.u32 %s298_s22, 4  ;;  %s286_s15 = scalar_lea.sflag [#allocation4], %s842_s21  ;;  %s303_s29 = int_to_ptr.hbm [resolvable:$true] %s302_s29 }
  0x2d   : > { %s617_s30 = sshra.s32 %s303_s29, 4  ;;  %s623_s20 = scalar_lea.hbm %s903_s3, 4  ;;  %s618_s30 = int_to_ptr.hbm [resolvable:$true] %s617_s30 }
  0x2e   : > { %s619_s4 = scalar_lea.hbm %s618_s30, 2  ;;  %p624_p10 = scmp.lt.s32.totalorder %s618_s30, %s903_s3 }
  0x2f   : > { %p620_p7 = scmp.ne.s32.totalorder %s618_s30, %s619_s4  ;;  %p625_p11 = scmp.lt.s32.totalorder %s623_s20, %s619_s4 }
  0x31   : > { %p621_p8 = pnand %p620_p7, %p809_p0  ;;  %p626_p12 = por %p625_p11, %p624_p10 }
  0x33   : > { %510 = vset.pattern.permute.xlu0 %v698_v3  ;;  %p622_p9 = pneg %p621_p8 }
  0x34   : > { %277 = vperm.xlu0 %510, %v261_v2  }
  0x35   : > { %p627_p13 = pnand %p626_p12, %p622_p9 }
  0x9d   : > { %v273_v4 = vpop.permute.xlu0 %272  ;;  %v268_v6 = vpop.permute.xlu1 %267 }
  0x9e   : > { %vm270_vm0 = vcmp.lt.f32.partialorder %v512_v5, %v268_v6  ;;  %v275_v8 = vadd.f32 %v512_v5, %v273_v4 }
  0xa6   : > { %v278_v7 = vpop.permute.xlu0 %277 }
  0xa7   : > { %v280_v9 = vsub.f32 %v278_v7, %v512_v5 }
  0xa9   : > { %v281_v11 = vsel %vm270_vm0, %v275_v8, %v280_v9 }
  0xaa   : > { %v283_v12 = vmul.f32 %v282_v10, %v281_v11 }
  0xac   : > { %284 = vst [vmem:[%s259_s24] sm:$0x3] %v283_v12 }
  0xad   : > { %630 = shalt.err (!%p627_p13)
}
  0xae   : > { %436 = dma.vmem_to_hbm [thread:$0]  (%p809_p0), %s301_s27, 32, %s303_s29, %s286_s15  }
  0xaf PF: > { %s314_s21 = sand.u32 1, %s673_s12   ;;  %p450_p4 = pnand %p417_p3, %p813_p2 }
  0xb0   : > { %s315_s23 = scalar_lea.sflag [#allocation4], %s314_s21 }
  0xb1   : > { %p451_p5 = pneg %p450_p4 }
  0xb3   : > { %668 = dma.done.wait (%p451_p5), %s315_s23, 32  }
  0xb4   : > { %670 = vsyncadd (%p451_p5), %s315_s23, 4294967264  ;;  %s20_s17 = sadd.s32 1, %s693_s17   ;;  %s910_s12 = smov %s677_s13 }
  0xb5   : > { %p17_p1 = scmp.ge.s32.totalorder %s20_s17, 4   ;;  %s911_s13 = smov %s681_s14 }
  0xb6   : > { %s912_s14 = smov %s771_s25  ;;  %s913_s15 = smov %s689_s16 }
  0xb7   : > { %s914_s16 = smov %s916_s18  ;;  %19 = sbr.rel (!%p17_p1) target bundleno = 7 (0x7), region = 93 }
  0xbc   :  { %321 = vsyncpa [#allocation3], 1 }
  0xbd   :  { %323 = vsyncpa [#allocation3 + $0x1], 1 }
  0xbe   :  { %324 = vsyncpa [#allocation6], 1 }
  0xbf   :  { %325 = vsyncpa [#allocation4], 1 }
  0xc0   :  { %327 = vsyncpa [#allocation4 + $0x1], 1 }

</bundles_post_ra>
